<compile_context>
chip_gen: v7x
topology: tpu7x:2x2x1
jax: 0.10.0
libtpu: 0.0.40
codegen_flags: <defaults>
</compile_context>

<pallas_src>
from functools import partial

import jax
import jax.numpy as jnp
from jax.experimental import pallas as pl
from jax.experimental.pallas import tpu as pltpu

GAMMA = 2.0   # encoded as explicit squares below
ALPHA = 0.5


def _focal_loss_kernel(d_ref, t_ref, o_ref, acc_ref, *, n_valid: int):
    # d_ref: (BR, BC) f32   d = logit[:,1] - logit[:,0]
    # t_ref: (BR, BC) f32   target in {0, 1}
    # o_ref: (1, 1)   f32   scalar mean loss (SMEM, resident across the grid)
    # acc_ref: (1,)   f32   SMEM running sum scratch
    i = pl.program_id(0)

    @pl.when(i == 0)
    def _init():
        acc_ref[0] = jnp.float32(0.0)

    d = d_ref[...]
    t = t_ref[...]

    # p = sigmoid(d) == softmax(x, axis=1)[:, 1]; numerically stable log-sigmoid form.
    #   softplus(d) = max(d, 0) + log(1 + exp(-|d|))
    #   log(p)   = d - softplus(d)
    #   log(1-p) = -softplus(d)
    e = jnp.exp(-jnp.abs(d))                              # in (0, 1]; 1 EUP exp
    softplus = jnp.maximum(d, 0.0) + jnp.log(1.0 + e)     # 1 EUP log
    log_p = d - softplus
    log_1mp = -softplus
    inv = 1.0 / (1.0 + e)                                 # exact recip (Newton-refined)
    pos = d >= 0.0
    p = jnp.where(pos, inv, e * inv)                      # sigmoid(d), stable both tails
    one_m_p = jnp.where(pos, e * inv, inv)                # 1 - p, stable both tails

    # gamma == 2 -> explicit squares (VPU), no pow = exp(g*log) on the EUP.
    loss = (-ALPHA * (one_m_p * one_m_p) * (t * log_p)
            - (1.0 - ALPHA) * (p * p) * ((1.0 - t) * log_1mp))

    # Mask out the zero-padded tail so it does not contaminate the sum.
    br, bc = loss.shape
    row_ids = jax.lax.broadcasted_iota(jnp.int32, (br, bc), 0)
    col_ids = jax.lax.broadcasted_iota(jnp.int32, (br, bc), 1)
    flat_idx = (i * br + row_ids) * bc + col_ids
    loss = jnp.where(flat_idx < n_valid, loss, 0.0)

    acc_ref[0] += jnp.sum(loss)

    @pl.when(i == pl.num_programs(0) - 1)
    def _finalize():
        o_ref[0, 0] = acc_ref[0] * jnp.float32(1.0 / n_valid)


def focal_loss(inputs, target, *, block_cols=512, max_block_rows=256):
    """inputs: (N, 2) logits, target: (N,) in {0,1}. Returns scalar mean focal loss."""
    n, c = inputs.shape
    assert c == 2, "FocalLoss as written indexes class 1 of a softmax over dim=1"
    assert block_cols % 128 == 0 and max_block_rows % 8 == 0

    # 2-class softmax prob of class 1 == sigmoid(x1 - x0): ship only the difference.
    d = (inputs[:, 1] - inputs[:, 0]).astype(jnp.float32)     # (N,)
    t = target.reshape(n).astype(jnp.float32)                 # (N,)

    # Lane/sublane-dense tiling: pad N up to (rows_padded, block_cols) with rows_padded a
    # multiple of block_rows (itself a multiple of 8).
    rows = -(-n // block_cols)
    rows8 = -(-rows // 8) * 8
    block_rows = min(rows8, max_block_rows)
    rows_padded = -(-rows8 // block_rows) * block_rows
    pad = rows_padded * block_cols - n
    d2 = jnp.pad(d, (0, pad)).reshape(rows_padded, block_cols)
    t2 = jnp.pad(t, (0, pad)).reshape(rows_padded, block_cols)
    num_tiles = rows_padded // block_rows

    kernel = partial(_focal_loss_kernel, n_valid=n)
    out = pl.pallas_call(
        kernel,
        out_shape=jax.ShapeDtypeStruct((1, 1), jnp.float32),
        grid_spec=pltpu.PrefetchScalarGridSpec(
            num_scalar_prefetch=0,
            grid=(num_tiles,),
            in_specs=[
                pl.BlockSpec((block_rows, block_cols), lambda i: (i, 0)),
                pl.BlockSpec((block_rows, block_cols), lambda i: (i, 0)),
            ],
            out_specs=pl.BlockSpec((1, 1), lambda i: (0, 0), memory_space=pltpu.SMEM),
            scratch_shapes=[pltpu.SMEM((1,), jnp.float32)],
        ),
        compiler_params=pltpu.CompilerParams(dimension_semantics=("arbitrary",)),
    )(d2, t2)
    return out[0, 0]


def _focal_loss_ref(inputs, target):
    pt = jax.nn.softmax(inputs.astype(jnp.float32), axis=1)
    p = pt[:, 1]
    t = target.astype(jnp.float32)
    loss = (-ALPHA * (1.0 - p) ** GAMMA * (t * jnp.log(p))
            - (1.0 - ALPHA) * p ** GAMMA * ((1.0 - t) * jnp.log(1.0 - p)))
    return jnp.mean(loss)


if __name__ == "__main__":
    key = jax.random.PRNGKey(0)
    k1, k2 = jax.random.split(key)

    N, C = 3000, 2
    logits = jax.random.normal(k1, (N, C), dtype=jnp.float32)
    target = jax.random.bernoulli(k2, 0.5, (N,)).astype(jnp.float32)

    ref = _focal_loss_ref(logits, target)

    # Default tiling (single tile here, exercises masking of the padded tail).
    out_a = jax.block_until_ready(focal_loss(logits, target))
    assert jnp.allclose(out_a, ref, rtol=1e-4, atol=1e-6), (out_a, ref)

    # Small tiles -> multi-step grid, exercises the cross-step accumulator + finalize.
    out_b = jax.block_until_ready(focal_loss(logits, target, block_cols=128, max_block_rows=8))
    assert jnp.allclose(out_b, ref, rtol=1e-4, atol=1e-6), (out_b, ref)

    print("KERNEL_OK")
</pallas_src>

<mosaic_0001>
module attributes {stable_mosaic.version = 11 : i64} {
  func.func @_focal_loss_kernel(%arg0: i32, %arg1: memref<8x512xf32, #tpu.memory_space<vmem>>, %arg2: memref<8x512xf32, #tpu.memory_space<vmem>>, %arg3: memref<1x1xf32, #tpu.memory_space<smem>>, %arg4: memref<1xf32, #tpu.memory_space<smem>>) attributes {dimension_semantics = [#tpu.dimension_semantics<arbitrary>], iteration_bounds = array<i64: 1>, scalar_prefetch = 0 : i64, scratch_operands = 1 : i64, tpu.core_type = #tpu.core_type<tc>, window_params = [{transform_indices = @transform_0, window_bounds = array<i64: 8, 512>}, {transform_indices = @transform_1, window_bounds = array<i64: 8, 512>}, {transform_indices = @transform_2, window_bounds = array<i64: 1, 1>}]} {
    %c0_i32 = arith.constant 0 : i32
    %0 = arith.cmpi eq, %arg0, %c0_i32 : i32
    %1 = arith.extui %0 : i1 to i32
    %c0_i32_0 = arith.constant 0 : i32
    %2 = arith.cmpi ne, %1, %c0_i32_0 : i32
    scf.if %2 {
      %cst_19 = arith.constant 0.000000e+00 : f32
      %c0_20 = arith.constant 0 : index
      %63 = memref.load %arg4[%c0_20] : memref<1xf32, #tpu.memory_space<smem>>
      memref.store %cst_19, %arg4[%c0_20] : memref<1xf32, #tpu.memory_space<smem>>
    } else {
    }
    %c0 = arith.constant 0 : index
    %c0_1 = arith.constant 0 : index
    %3 = vector.load %arg1[%c0, %c0_1] : memref<8x512xf32, #tpu.memory_space<vmem>>, vector<8x512xf32>
    %c0_2 = arith.constant 0 : index
    %c0_3 = arith.constant 0 : index
    %4 = vector.load %arg2[%c0_2, %c0_3] : memref<8x512xf32, #tpu.memory_space<vmem>>, vector<8x512xf32>
    %5 = math.absf %3 : vector<8x512xf32>
    %cst = arith.constant 0.000000e+00 : f32
    %6 = vector.broadcast %cst : f32 to vector<8x512xf32>
    %7 = arith.subf %6, %5 : vector<8x512xf32>
    %8 = math.exp %7 : vector<8x512xf32>
    %cst_4 = arith.constant 0.000000e+00 : f32
    %9 = vector.broadcast %cst_4 : f32 to vector<8x512xf32>
    %10 = arith.maximumf %3, %9 : vector<8x512xf32>
    %cst_5 = arith.constant 1.000000e+00 : f32
    %11 = vector.broadcast %cst_5 : f32 to vector<8x512xf32>
    %12 = arith.addf %11, %8 : vector<8x512xf32>
    %13 = math.log %12 : vector<8x512xf32>
    %14 = arith.addf %10, %13 : vector<8x512xf32>
    %15 = arith.subf %3, %14 : vector<8x512xf32>
    %cst_6 = arith.constant 0.000000e+00 : f32
    %16 = vector.broadcast %cst_6 : f32 to vector<8x512xf32>
    %17 = arith.subf %16, %14 : vector<8x512xf32>
    %cst_7 = arith.constant 1.000000e+00 : f32
    %18 = vector.broadcast %cst_7 : f32 to vector<8x512xf32>
    %19 = arith.addf %18, %8 : vector<8x512xf32>
    %cst_8 = arith.constant 1.000000e+00 : f32
    %20 = vector.broadcast %cst_8 : f32 to vector<8x512xf32>
    %21 = arith.divf %20, %19 : vector<8x512xf32>
    %cst_9 = arith.constant 0.000000e+00 : f32
    %22 = vector.broadcast %cst_9 : f32 to vector<8x512xf32>
    %23 = arith.cmpf oge, %3, %22 : vector<8x512xf32>
    %24 = arith.mulf %8, %21 : vector<8x512xf32>
    %25 = arith.select %23, %21, %24 : vector<8x512xi1>, vector<8x512xf32>
    %26 = arith.mulf %8, %21 : vector<8x512xf32>
    %27 = arith.select %23, %26, %21 : vector<8x512xi1>, vector<8x512xf32>
    %28 = arith.mulf %27, %27 : vector<8x512xf32>
    %cst_10 = arith.constant -5.000000e-01 : f32
    %29 = vector.broadcast %cst_10 : f32 to vector<8x512xf32>
    %30 = arith.mulf %29, %28 : vector<8x512xf32>
    %31 = arith.mulf %4, %15 : vector<8x512xf32>
    %32 = arith.mulf %30, %31 : vector<8x512xf32>
    %33 = arith.mulf %25, %25 : vector<8x512xf32>
    %cst_11 = arith.constant 5.000000e-01 : f32
    %34 = vector.broadcast %cst_11 : f32 to vector<8x512xf32>
    %35 = arith.mulf %34, %33 : vector<8x512xf32>
    %cst_12 = arith.constant 1.000000e+00 : f32
    %36 = vector.broadcast %cst_12 : f32 to vector<8x512xf32>
    %37 = arith.subf %36, %4 : vector<8x512xf32>
    %38 = arith.mulf %37, %17 : vector<8x512xf32>
    %39 = arith.mulf %35, %38 : vector<8x512xf32>
    %40 = arith.subf %32, %39 : vector<8x512xf32>
    %41 = tpu.iota {dimensions = array<i32: 0>} : vector<8x512xi32>
    %42 = tpu.iota {dimensions = array<i32: 1>} : vector<8x512xi32>
    %c8_i32 = arith.constant 8 : i32
    %43 = arith.muli %arg0, %c8_i32 : i32
    %44 = vector.broadcast %43 : i32 to vector<8x512xi32>
    %45 = arith.addi %44, %41 : vector<8x512xi32>
    %c512_i32 = arith.constant 512 : i32
    %46 = vector.broadcast %c512_i32 : i32 to vector<8x512xi32>
    %47 = arith.muli %45, %46 : vector<8x512xi32>
    %48 = arith.addi %47, %42 : vector<8x512xi32>
    %c3000_i32 = arith.constant 3000 : i32
    %49 = vector.broadcast %c3000_i32 : i32 to vector<8x512xi32>
    %50 = arith.cmpi slt, %48, %49 : vector<8x512xi32>
    %cst_13 = arith.constant 0.000000e+00 : f32
    %51 = vector.broadcast %cst_13 : f32 to vector<8x512xf32>
    %52 = arith.select %50, %40, %51 : vector<8x512xi1>, vector<8x512xf32>
    %c0_14 = arith.constant 0 : index
    %53 = memref.load %arg4[%c0_14] : memref<1xf32, #tpu.memory_space<smem>>
    %54 = vector.shape_cast %52 : vector<8x512xf32> to vector<1x8x512xf32>
    %cst_15 = arith.constant dense<0.000000e+00> : vector<1xf32>
    %55 = vector.multi_reduction <add>, %54, %cst_15 [1, 2] : vector<1x8x512xf32> to vector<1xf32>
    %56 = vector.shape_cast %55 : vector<1xf32> to vector<1x1x1xf32>
    %57 = vector.extract %56[0, 0, 0] : f32 from vector<1x1x1xf32>
    %58 = arith.addf %53, %57 : f32
    %c0_16 = arith.constant 0 : index
    %59 = memref.load %arg4[%c0_16] : memref<1xf32, #tpu.memory_space<smem>>
    memref.store %58, %arg4[%c0_16] : memref<1xf32, #tpu.memory_space<smem>>
    %c0_i32_17 = arith.constant 0 : i32
    %60 = arith.cmpi eq, %arg0, %c0_i32_17 : i32
    %61 = arith.extui %60 : i1 to i32
    %c0_i32_18 = arith.constant 0 : i32
    %62 = arith.cmpi ne, %61, %c0_i32_18 : i32
    scf.if %62 {
      %c0_19 = arith.constant 0 : index
      %63 = memref.load %arg4[%c0_19] : memref<1xf32, #tpu.memory_space<smem>>
      %cst_20 = arith.constant 3.3333333E-4 : f32
      %64 = arith.mulf %63, %cst_20 : f32
      %c0_21 = arith.constant 0 : index
      %c0_22 = arith.constant 0 : index
      %65 = memref.load %arg3[%c0_21, %c0_22] : memref<1x1xf32, #tpu.memory_space<smem>>
      memref.store %64, %arg3[%c0_21, %c0_22] : memref<1x1xf32, #tpu.memory_space<smem>>
    } else {
    }
    return
  }
  func.func @transform_0(%arg0: i32) -> (i32, i32) {
    %c0_i32 = arith.constant 0 : i32
    %c0_i32_0 = arith.constant 0 : i32
    return %arg0, %c0_i32 : i32, i32
  }
  func.func @transform_1(%arg0: i32) -> (i32, i32) {
    %c0_i32 = arith.constant 0 : i32
    %c0_i32_0 = arith.constant 0 : i32
    return %arg0, %c0_i32 : i32, i32
  }
  func.func @transform_2(%arg0: i32) -> (i32, i32) {
    %c0_i32 = arith.constant 0 : i32
    %c0_i32_0 = arith.constant 0 : i32
    %c0_i32_1 = arith.constant 0 : i32
    return %c0_i32, %c0_i32_0 : i32, i32
  }
}

</mosaic_0001>

<bundles_post_ra>
// kernel: tpu_custom_call.1
= control target key start
LH: loop header
LB: loop body
LE: loop exit
PB: predicated region body
PF: predicated region fallthrough
CT: control target
= control target key end

     0   :  { %7 = vsyncpa [#allocation4], 0  ;;  %s440_s0 = inlined_call_operand.hbm [shape: f32[8,512], index: 0, kind: input, shape index: {}]   ;;  %s441_s1 = inlined_call_operand.hbm [shape: f32[8,512], index: 1, kind: input, shape index: {}]   ;;  %s442_s2 = inlined_call_operand.hbm [shape: f32[1,1], index: 2, kind: output, shape index: {}]  }
   0x1   :  { %8 = vsyncpa [#allocation7], 0 }
   0x2   :  { %9 = vsyncpa [#allocation5], 0  ;;  %s308_s9 = smov [#allocation3]   ;;  %s309_s11 = smov [#allocation6]  }
   0x3   :  { %s16_s10 = sshll.u32 %s308_s9, 4  ;;  %s26_s12 = sshll.u32 %s309_s11, 4  ;;  %s17_s10 = int_to_ptr.vmem [resolvable:$true] %s16_s10  ;;  %s27_s12 = int_to_ptr.vmem [resolvable:$true] %s26_s12 }
   0x4   :  { %s248_s15 = scalar_lea.hbm %s440_s0, 512 }
   0x5   :  { %p249_p0 = scmp.ne.s32.totalorder %s440_s0, %s248_s15  ;;  %p252_p1 = scmp.lt.u32.totalorder %s248_s15, %s440_s0 }
   0x7   :  { %p254_p2 = pnand %p252_p1, %p249_p0 }
   0x9   :  { %257 = shalt.err (!%p254_p2)
}
   0xa   :  { %s258_s20 = scalar_lea.vmem %s17_s10, 512  ;;  %p263_p4 = scmp.lt.s32.totalorder %s17_s10, %s17_s10 }
   0xb   :  { %p259_p3 = scmp.ne.s32.totalorder %s17_s10, %s258_s20  ;;  %p264_p5 = scmp.lt.s32.totalorder %s258_s20, %s258_s20 }
   0xd   :  { %p265_p6 = por %p264_p5, %p263_p4 }
   0xf   :  { %p266_p7 = pnand %p265_p6, %p259_p3 }
  0x11   :  { %269 = shalt.err (!%p266_p7)
}
  0x12   :  { %19 = dma.hbm_to_vmem [thread:$0]  %s440_s0, 512, %s17_s10, [#allocation4]  }
  0x13   :  { %s270_s25 = scalar_lea.hbm %s441_s1, 512 }
  0x14   :  { %p271_p8 = scmp.ne.s32.totalorder %s441_s1, %s270_s25  ;;  %p274_p9 = scmp.lt.u32.totalorder %s270_s25, %s441_s1 }
  0x16   :  { %p276_p10 = pnand %p274_p9, %p271_p8 }
  0x18   :  { %279 = shalt.err (!%p276_p10)
}
  0x19   :  { %s280_s30 = scalar_lea.vmem %s27_s12, 512  ;;  %p285_p12 = scmp.lt.s32.totalorder %s27_s12, %s27_s12 }
  0x1a   :  { %p281_p11 = scmp.ne.s32.totalorder %s27_s12, %s280_s30  ;;  %p286_p13 = scmp.lt.s32.totalorder %s280_s30, %s280_s30 }
  0x1c   :  { %p287_p0 = por %p286_p13, %p285_p12 }
  0x1e   :  { %p288_p1 = pnand %p287_p0, %p281_p11 }
  0x20   :  { %291 = shalt.err (!%p288_p1)
}
  0x21   :  { %29 = dma.hbm_to_vmem [thread:$0]  %s441_s1, 512, %s27_s12, [#allocation7]  }
  0x22   :  { %302 = dma.done.wait [#allocation4], 512  }
  0x23   :  { %303 = vsyncadd [#allocation4], 4294966784 }
  0x24   :  { %304 = dma.done.wait [#allocation7], 512  }
  0x25   :  { %305 = vsyncadd [#allocation7], 4294966784  ;;  %v350_v0 = vld [vmem:[#allocation3] sm:$0xff]  ;;  %v352_v1 = vld [vmem:[#allocation3 + $0x8] sm:$0xff]  ;;  %v158_v19 = vlaneseq  ;;  %s292_s7 = scalar_lea.hbm %s442_s2, 16 }
  0x26   :  { %v354_v2 = vld [vmem:[#allocation3 + $0x10] sm:$0xff]  ;;  %v356_v3 = vld [vmem:[#allocation3 + $0x18] sm:$0xff]  ;;  %v50_v4 = vand.u32 2147483647, %v350_v0  ;;  %v51_v5 = vand.u32 2147483647, %v352_v1  ;;  %p293_p2 = scmp.ne.s32.totalorder %s442_s2, %s292_s7  ;;  %p296_p3 = scmp.lt.u32.totalorder %s292_s7, %s442_s2 }
  0x27   :  { %v52_v6 = vand.u32 2147483647, %v354_v2  ;;  %v53_v7 = vand.u32 2147483647, %v356_v3  ;;  %v159_v25 = vshrl.u32 %v158_v19, 7  ;;  %v161_v26 = vand.u32 127, %v158_v19 }
  0x28   :  { %v54_v8 = vsub.f32 0.0, %v50_v4  ;;  %v55_v9 = vsub.f32 0.0, %v51_v5  ;;  %v66_v29 = vmax.f32 %v350_v0, 0.0  ;;  %v370_v32 = vld [vmem:[#allocation6] sm:$0xff]  ;;  %v372_v33 = vld [vmem:[#allocation6 + $0x8] sm:$0xff]  ;;  %v374_v34 = vld [vmem:[#allocation6 + $0x10] sm:$0xff]  ;;  %p298_p4 = pnand %p296_p3, %p293_p2 }
  0x29   :  { %v56_v10 = vsub.f32 0.0, %v52_v6  ;;  %v57_v11 = vsub.f32 0.0, %v53_v7  ;;  %v162_v27 = vadd.s32 128, %v161_v26  ;;  %v365_v28 = vmul.u32 512, %v159_v25  ;;  %v385_v40 = vld [vmem:[#allocation6 + $0x18] sm:$0xff] }
  0x2a   :  { %v58_v12 = vmul.f32 1.442695, %v54_v8  ;;  %v60_v13 = vmul.f32 1.442695, %v55_v9  ;;  %v368_v30 = vadd.s32 256, %v161_v26  ;;  %v67_v35 = vmax.f32 %v352_v1, 0.0 }
  0x2b   :  { %v62_v14 = vmul.f32 1.442695, %v56_v10  ;;  %v64_v15 = vmul.f32 1.442695, %v57_v11  ;;  %v377_v36 = vadd.s32 384, %v161_v26  ;;  %v380_v37 = vadd.s32 %v365_v28, %v161_v26 }
  0x2c   :  { %224 = vpow2.f32 %v58_v12  ;;  %v383_v38 = vadd.s32 %v365_v28, %v162_v27  ;;  %v68_v41 = vmax.f32 %v354_v2, 0.0  ;;  %v69_v42 = vmax.f32 %v356_v3, 0.0 }
  0x2d   :  { %226 = vpow2.f32 %v60_v13  ;;  %vm102_vm0 = vcmp.ge.f32.partialorder %v350_v0, 0.0  ;;  %vm103_vm1 = vcmp.ge.f32.partialorder %v352_v1, 0.0  ;;  %vm104_vm2 = vcmp.ge.f32.partialorder %v354_v2, 0.0 }
  0x2e   :  { %228 = vpow2.f32 %v62_v14  ;;  %vm105_vm3 = vcmp.ge.f32.partialorder %v356_v3, 0.0  ;;  %v142_v49 = vsub.f32 1.0, %v370_v32  ;;  %v143_v50 = vsub.f32 1.0, %v372_v33 }
  0x2f   :  { %230 = vpow2.f32 %v64_v15  ;;  %v144_v54 = vsub.f32 1.0, %v374_v34  ;;  %v145_v55 = vsub.f32 1.0, %v385_v40  ;;  %vm173_vm4 = vcmp.lt.s32.totalorder %v380_v37, 3000 }
  0x30   :  { %vm174_vm5 = vcmp.lt.s32.totalorder %v383_v38, 3000 }
  0x36   :  { %v225_v16 = vpop.eup %224 }
  0x37   :  { %v227_v17 = vpop.eup %226  ;;  %v70_v18 = vadd.f32 1.0, %v225_v16 }
  0x38   :  { %v229_v20 = vpop.eup %228  ;;  %v71_v21 = vadd.f32 1.0, %v227_v17 }
  0x39   :  { %v362_v22 = vpop.eup %230  ;;  %v72_v23 = vadd.f32 1.0, %v229_v20  ;;  %232 = vlog2.f32 %v70_v18 }
  0x3a   :  { %v73_v24 = vadd.f32 1.0, %v362_v22  ;;  %234 = vlog2.f32 %v71_v21 }
  0x3b   :  { %236 = vlog2.f32 %v72_v23 }
  0x3c   :  { %238 = vlog2.f32 %v73_v24 }
  0x3d   :  { %240 = vrcp.f32 %v70_v18 }
  0x3e   :  { %242 = vrcp.f32 %v71_v21 }
  0x3f   :  { %244 = vrcp.f32 %v72_v23 }
  0x40   :  { %246 = vrcp.f32 %v73_v24 }
  0x43   :  { %v233_v31 = vpop.eup %232 }
  0x44   :  { %v235_v39 = vpop.eup %234  ;;  %v75_v43 = vmul.f32 0.6931472, %v233_v31 }
  0x45   :  { %v237_v44 = vpop.eup %236  ;;  %v77_v45 = vmul.f32 0.6931472, %v235_v39 }
  0x46   :  { %v239_v46 = vpop.eup %238  ;;  %v79_v47 = vmul.f32 0.6931472, %v237_v44  ;;  %v82_v48 = vadd.f32 %v75_v43, %v66_v29 }
  0x47   :  { %v241_v51 = vpop.eup %240  ;;  %v81_v52 = vmul.f32 0.6931472, %v239_v46  ;;  %v83_v53 = vadd.f32 %v77_v45, %v67_v35 }
  0x48   :  { %v243_v56 = vpop.eup %242  ;;  %v84_v57 = vadd.f32 %v79_v47, %v68_v41  ;;  %v86_v58 = vsub.f32 %v350_v0, %v82_v48  ;;  %v90_v59 = vsub.f32 0.0, %v82_v48  ;;  %v106_v60 = vmul.f32 %v241_v51, %v225_v16 }
  0x49   :  { %v245_v61 = vpop.eup %244  ;;  %v85_v62 = vadd.f32 %v81_v52, %v69_v42  ;;  %v87_v63 = vsub.f32 %v352_v1, %v83_v53  ;;  %v91_v4 = vsub.f32 0.0, %v83_v53  ;;  %v107_v5 = vmul.f32 %v243_v56, %v227_v17 }
  0x4a   :  { %v247_v6 = vpop.eup %246  ;;  %v88_v7 = vsub.f32 %v354_v2, %v84_v57  ;;  %v92_v8 = vsub.f32 0.0, %v84_v57  ;;  %v108_v9 = vmul.f32 %v245_v61, %v229_v20  ;;  %v110_v10 = vsel %vm102_vm0, %v241_v51, %v106_v60 }
  0x4b   :  { %v89_v11 = vsub.f32 %v356_v3, %v85_v62  ;;  %v93_v12 = vsub.f32 0.0, %v85_v62  ;;  %v109_v13 = vmul.f32 %v247_v6, %v362_v22  ;;  %v111_v14 = vsel %vm103_vm1, %v243_v56, %v107_v5 }
  0x4c   :  { %v112_v15 = vsel %vm104_vm2, %v245_v61, %v108_v9  ;;  %v114_v16 = vsel %vm102_vm0, %v106_v60, %v241_v51  ;;  %v115_v17 = vsel %vm103_vm1, %v107_v5, %v243_v56  ;;  %v116_v18 = vsel %vm104_vm2, %v108_v9, %v245_v61 }
  0x4d   :  { %v113_v19 = vsel %vm105_vm3, %v247_v6, %v109_v13  ;;  %v117_v20 = vsel %vm105_vm3, %v109_v13, %v247_v6  ;;  %v118_v21 = vmul.f32 %v114_v16, %v114_v16  ;;  %v119_v22 = vmul.f32 %v115_v17, %v115_v17 }
  0x4e   :  { %v120_v23 = vmul.f32 %v116_v18, %v116_v18  ;;  %v121_v24 = vmul.f32 %v117_v20, %v117_v20  ;;  %v126_v25 = vmul.f32 %v86_v58, %v370_v32  ;;  %v127_v0 = vmul.f32 %v87_v63, %v372_v33 }
  0x4f   :  { %v122_v26 = vmul.f32 -0.5, %v118_v21  ;;  %v123_v1 = vmul.f32 -0.5, %v119_v22  ;;  %v128_v27 = vmul.f32 %v88_v7, %v374_v34  ;;  %v129_v2 = vmul.f32 %v89_v11, %v385_v40 }
  0x50   :  { %v124_v29 = vmul.f32 -0.5, %v120_v23  ;;  %v125_v31 = vmul.f32 -0.5, %v121_v24  ;;  %v134_v35 = vmul.f32 %v110_v10, %v110_v10  ;;  %v135_v39 = vmul.f32 %v111_v14, %v111_v14 }
  0x51   :  { %v136_v3 = vmul.f32 %v112_v15, %v112_v15  ;;  %v137_v41 = vmul.f32 %v113_v19, %v113_v19  ;;  %v171_v42 = vadd.s32 %v365_v28, %v368_v30  ;;  %v172_v32 = vadd.s32 %v365_v28, %v377_v36 }
  0x52   :  { %v130_v43 = vmul.f32 %v126_v25, %v122_v26  ;;  %v131_v33 = vmul.f32 %v127_v0, %v123_v1  ;;  %v138_v44 = vmul.f32 0.5, %v134_v35  ;;  %v139_v45 = vmul.f32 0.5, %v135_v39 }
  0x53   :  { %v140_v46 = vmul.f32 0.5, %v136_v3  ;;  %v141_v34 = vmul.f32 0.5, %v137_v41  ;;  %v146_v47 = vmul.f32 %v142_v49, %v90_v59  ;;  %v147_v40 = vmul.f32 %v143_v50, %v91_v4 }
  0x54   :  { %v132_v48 = vmul.f32 %v128_v27, %v124_v29  ;;  %v133_v51 = vmul.f32 %v129_v2, %v125_v31  ;;  %v148_v52 = vmul.f32 %v144_v54, %v92_v8  ;;  %v149_v53 = vmul.f32 %v145_v55, %v93_v12 }
  0x55   :  { %v150_v56 = vmul.f32 %v146_v47, %v138_v44  ;;  %v151_v57 = vmul.f32 %v147_v40, %v139_v45  ;;  %vm175_vm6 = vcmp.lt.s32.totalorder %v171_v42, 3000  ;;  %vm176_vm7 = vcmp.lt.s32.totalorder %v172_v32, 3000 }
  0x56   :  { %v152_v58 = vmul.f32 %v148_v52, %v140_v46  ;;  %v153_v60 = vmul.f32 %v149_v53, %v141_v34 }
  0x57   :  { %v154_v28 = vsub.f32 %v130_v43, %v150_v56  ;;  %v155_v30 = vsub.f32 %v131_v33, %v151_v57 }
  0x58   :  { %v156_v36 = vsub.f32 %v132_v48, %v152_v58  ;;  %v157_v61 = vsub.f32 %v133_v51, %v153_v60 }
  0x59   :  { %v177_v49 = vsel %vm173_vm4, %v154_v28, 0.0  ;;  %v178_v50 = vsel %vm174_vm5, %v155_v30, 0.0 }
  0x5a   :  { %v179_v59 = vsel %vm175_vm6, %v156_v36, 0.0  ;;  %v182_v62 = vadd.f32 %v178_v50, %v177_v49  ;;  %v180_v54 = vsel %vm176_vm7, %v157_v61, 0.0 }
  0x5c   :  { %v183_v55 = vadd.f32 %v182_v62, %v179_v59 }
  0x5e   :  { %v184_v63 = vadd.f32 %v183_v55, %v180_v54 }
  0x60   :  { %185 = vadd.xlane.f32.xlu0 %v184_v63 }
  0xed   :  { %v186_v4 = vpop.xlane.xlu0 %185 }
  0xee   :  { %v187_v5 = vrot.slane %v186_v4, 4 }
  0xf0   :  { %v188_v6 = vadd.f32 %v187_v5, %v186_v4 }
  0xf2   :  { %v189_v37 = vrot.slane %v188_v6, 2 }
  0xf4   :  { %v190_v7 = vadd.f32 %v189_v37, %v188_v6 }
  0xf6   :  { %v191_v38 = vrot.slane %v190_v7, 1 }
  0xf8   :  { %v192_v8 = vadd.f32 %v191_v38, %v190_v7 }
  0xfa   :  { %219 = vpush %v192_v8 }
 0x12b   :  { %s220_s1 = spop %219 }
 0x12c   :  { %s201_s4 = smul.f32 0.00033333333, %s220_s1 }
 0x12e   :  { %203 = sst [smem:[#allocation8]] %s201_s4 }
 0x12f   :  { %301 = shalt.err (!%p298_p4)
}
 0x130   :  { %s310_s12 = smov [#allocation8]  }
 0x131   :  { %211 = dma.smem_to_hbm %s310_s12, 16, %s442_s2, [#allocation5]  }
 0x132   :  { %306 = dma.done.wait [#allocation5], 16  }
 0x133   :  { %307 = vsyncadd [#allocation5], 4294967280 }
 0x134   :  { %215 = sfence }
 0x135   :  { %216 = vsyncpa [#allocation4], 1 }
 0x136   :  { %217 = vsyncpa [#allocation7], 1 }
 0x137   :  { %218 = vsyncpa [#allocation5], 1 }

</bundles_post_ra>
